<compile_context>
chip_gen: v7x
topology: tpu7x:2x2x1
jax: 0.10.0
libtpu: 0.0.40
codegen_flags: <defaults>
</compile_context>

<pallas_src>
import jax
import jax.numpy as jnp
from jax.experimental import pallas as pl
from jax.experimental.pallas import tpu as pltpu


def _round_up(n, m):
    return ((n + m - 1) // m) * m


def mlp_kernel(x_ref, w1_ref, b1_ref, w2_ref, b2_ref, w3_ref, b3_ref,
               w4_ref, b4_ref, o_ref):
    # x arrives as f32 and is cast to bf16 in-kernel (halves x-related HBM
    # traffic vs. a wrapper-side cast). bf16 x bf16 -> f32 on the MXU; bias-add
    # and ReLU run on the f32 accumulator; downcast to bf16 only to feed the
    # next matmul.
    h = x_ref[...].astype(jnp.bfloat16)
    h = jnp.dot(h, w1_ref[...], preferred_element_type=jnp.float32) + b1_ref[...]
    h = jnp.maximum(h, 0.0).astype(jnp.bfloat16)          # ReLU
    h = jnp.dot(h, w2_ref[...], preferred_element_type=jnp.float32) + b2_ref[...]
    h = jnp.maximum(h, 0.0).astype(jnp.bfloat16)          # ReLU
    h = jnp.dot(h, w3_ref[...], preferred_element_type=jnp.float32) + b3_ref[...]
    h = jnp.maximum(h, 0.0).astype(jnp.bfloat16)          # ReLU
    h = jnp.dot(h, w4_ref[...], preferred_element_type=jnp.float32) + b4_ref[...]
    o_ref[...] = h.astype(o_ref.dtype)


def _choose_tile_b(batch, requested):
    """Batch tile: multiple of 16 (bf16 sublane packing), big enough to
    amortize per-grid-step overhead, and producing >=2 grid steps whenever the
    batch permits (so v7x's two TensorCores both get work)."""
    requested = max(16, int(requested))
    if batch <= 32:
        # Single block equal to the full batch dim (always a legal block shape).
        return batch
    tile = _round_up(min(requested, batch), 16)
    # Cap so the grid has at least 2 steps.
    tile = min(tile, _round_up(pl.cdiv(batch, 2), 16))
    return max(tile, 16)


def neural_net_forward(x, params, tile_b=512):
    (w1, b1), (w2, b2), (w3, b3), (w4, b4) = params
    batch, in_features = x.shape
    out_dim = w4.shape[1]

    # Lane-dense output only pays when out_dim is large enough; for a tiny
    # out_dim keep the true width (masked store, but far fewer HBM bytes than a
    # 128-lane-padded row).
    out_width = _round_up(out_dim, 128) if out_dim >= 64 else out_dim
    if out_width != out_dim:
        w4 = jnp.pad(w4, ((0, 0), (0, out_width - out_dim)))
        b4 = jnp.pad(b4, ((0, 0), (0, out_width - out_dim)))

    tile_b = _choose_tile_b(batch, tile_b)
    # No wrapper-side padding of x: Pallas clips the trailing partial block
    # (input pad region is ignored row-wise; out-of-bounds output rows are not
    # written back).
    grid = (pl.cdiv(batch, tile_b),)

    # Weights in bf16 (MXU operands); biases in f32 (added to the f32 accumulator).
    w1, w2, w3, w4 = (w.astype(jnp.bfloat16) for w in (w1, w2, w3, w4))
    b1, b2, b3, b4 = (b.astype(jnp.float32) for b in (b1, b2, b3, b4))

    def resident(a):
        # Same block index every grid step -> the block stays VMEM-resident.
        return pl.BlockSpec(a.shape, lambda i: (0,) * a.ndim)

    h1, h2, h3 = w1.shape[1], w2.shape[1], w3.shape[1]
    flops = 2 * batch * (in_features * h1 + h1 * h2 + h2 * h3 + h3 * out_width)
    bytes_accessed = (x.size * 4
                      + sum(w.size * 2 for w in (w1, w2, w3, w4))
                      + sum(b.size * 4 for b in (b1, b2, b3, b4))
                      + batch * out_width * 4)

    # Explicit VMEM budget: resident weights/biases + double-buffered x/out
    # tiles + live f32 activations, capped under v7x's 64 MiB physical VMEM.
    resident_bytes = (sum(w.size * 2 for w in (w1, w2, w3, w4))
                      + sum(b.size * 4 for b in (b1, b2, b3, b4)))
    widest = max(in_features, h1, h2, h3, out_width)
    stream_bytes = 2 * tile_b * (in_features * 4 + out_width * 4)   # double-buffered x/out
    act_bytes = 2 * tile_b * widest * 4                             # live f32 activations
    vmem_limit = int(min(max(2 * (resident_bytes + stream_bytes + act_bytes),
                             16 << 20), 64 << 20))

    out = pl.pallas_call(
        mlp_kernel,
        out_shape=jax.ShapeDtypeStruct((batch, out_width), jnp.float32),
        grid=grid,
        in_specs=[
            pl.BlockSpec((tile_b, in_features), lambda i: (i, 0)),
            resident(w1), resident(b1),
            resident(w2), resident(b2),
            resident(w3), resident(b3),
            resident(w4), resident(b4),
        ],
        out_specs=pl.BlockSpec((tile_b, out_width), lambda i: (i, 0)),
        compiler_params=pltpu.CompilerParams(
            dimension_semantics=("parallel",),
            vmem_limit_bytes=vmem_limit),
        cost_estimate=pl.CostEstimate(
            flops=flops, transcendentals=0, bytes_accessed=bytes_accessed),
    )(x, w1, b1, w2, b2, w3, b3, w4, b4)

    return out[:, :out_dim] if out_width != out_dim else out


def init_linear(key, in_features, out_features):
    # Mimics nn.Linear's default U(-1/sqrt(fan_in), 1/sqrt(fan_in)) init.
    kw, kb = jax.random.split(key)
    bound = 1.0 / jnp.sqrt(jnp.float32(in_features))
    w = jax.random.uniform(kw, (in_features, out_features), jnp.float32,
                           minval=-bound, maxval=bound)
    b = jax.random.uniform(kb, (1, out_features), jnp.float32,
                           minval=-bound, maxval=bound)
    return w, b


def reference_forward_f32(x, params):
    h = x
    for i, (w, b) in enumerate(params):
        h = h @ w + b
        if i < len(params) - 1:
            h = jnp.maximum(h, 0.0)
    return h


def reference_forward_bf16(x, params):
    # Mirrors the kernel's bf16-operand / f32-accumulate numerics exactly.
    h = x.astype(jnp.bfloat16)
    for i, (w, b) in enumerate(params):
        h = jnp.dot(h, w.astype(jnp.bfloat16),
                    preferred_element_type=jnp.float32) + b.astype(jnp.float32)
        if i < len(params) - 1:
            h = jnp.maximum(h, 0.0).astype(jnp.bfloat16)
    return h


if __name__ == "__main__":
    input_size, hidden_dim_1, hidden_dim_2, hidden_dim_3, output_dim = 32, 64, 32, 16, 8

    key = jax.random.PRNGKey(0)
    kx, kx2, k1, k2, k3, k4 = jax.random.split(key, 6)

    params = [
        init_linear(k1, input_size, hidden_dim_1),
        init_linear(k2, hidden_dim_1, hidden_dim_2),
        init_linear(k3, hidden_dim_2, hidden_dim_3),
        init_linear(k4, hidden_dim_3, output_dim),
    ]

    # Case 1: tiny batch (single block, grid = 1).
    batch = 8
    x = jax.random.normal(kx, (batch, input_size), jnp.float32)
    out = jax.block_until_ready(neural_net_forward(x, params))
    assert out.shape == (batch, output_dim), out.shape
    ref_bf16 = reference_forward_bf16(x, params)
    assert jnp.allclose(out, ref_bf16, atol=1e-4, rtol=1e-4), \
        "mismatch vs bf16-mirrored reference (batch=8)"
    ref_f32 = reference_forward_f32(x, params)
    assert jnp.allclose(out, ref_f32, atol=5e-2, rtol=5e-2), \
        "mismatch vs f32 reference beyond bf16 tolerance (batch=8)"

    # Case 2: batch that produces a multi-step grid (exercises the streamed /
    # parallel batch axis: tile_b=32, grid=(2,)).
    batch2 = 64
    x2 = jax.random.normal(kx2, (batch2, input_size), jnp.float32)
    out2 = jax.block_until_ready(neural_net_forward(x2, params))
    assert out2.shape == (batch2, output_dim), out2.shape
    ref2 = reference_forward_bf16(x2, params)
    assert jnp.allclose(out2, ref2, atol=1e-4, rtol=1e-4), \
        "mismatch vs bf16-mirrored reference (batch=64)"

    print("KERNEL_OK")
</pallas_src>

<mosaic_0001>
module attributes {stable_mosaic.version = 11 : i64} {
  func.func @mlp_kernel(%arg0: i32, %arg1: memref<8x32xf32, #tpu.memory_space<vmem>>, %arg2: memref<32x64xbf16, #tpu.memory_space<vmem>>, %arg3: memref<1x64xf32, #tpu.memory_space<vmem>>, %arg4: memref<64x32xbf16, #tpu.memory_space<vmem>>, %arg5: memref<1x32xf32, #tpu.memory_space<vmem>>, %arg6: memref<32x16xbf16, #tpu.memory_space<vmem>>, %arg7: memref<1x16xf32, #tpu.memory_space<vmem>>, %arg8: memref<16x8xbf16, #tpu.memory_space<vmem>>, %arg9: memref<1x8xf32, #tpu.memory_space<vmem>>, %arg10: memref<8x8xf32, #tpu.memory_space<vmem>>) attributes {dimension_semantics = [#tpu.dimension_semantics<parallel>], iteration_bounds = array<i64: 1>, scalar_prefetch = 0 : i64, scratch_operands = 0 : i64, tpu.core_type = #tpu.core_type<tc>, window_params = [{transform_indices = @transform_0, window_bounds = array<i64: 8, 32>}, {pipeline_mode = #tpu.pipeline_mode<synchronous>, transform_indices = @transform_1, window_bounds = array<i64: 32, 64>}, {pipeline_mode = #tpu.pipeline_mode<synchronous>, transform_indices = @transform_2, window_bounds = array<i64: 1, 64>}, {pipeline_mode = #tpu.pipeline_mode<synchronous>, transform_indices = @transform_3, window_bounds = array<i64: 64, 32>}, {pipeline_mode = #tpu.pipeline_mode<synchronous>, transform_indices = @transform_4, window_bounds = array<i64: 1, 32>}, {pipeline_mode = #tpu.pipeline_mode<synchronous>, transform_indices = @transform_5, window_bounds = array<i64: 32, 16>}, {pipeline_mode = #tpu.pipeline_mode<synchronous>, transform_indices = @transform_6, window_bounds = array<i64: 1, 16>}, {pipeline_mode = #tpu.pipeline_mode<synchronous>, transform_indices = @transform_7, window_bounds = array<i64: 16, 8>}, {pipeline_mode = #tpu.pipeline_mode<synchronous>, transform_indices = @transform_8, window_bounds = array<i64: 1, 8>}, {transform_indices = @transform_9, window_bounds = array<i64: 8, 8>}]} {
    %c0 = arith.constant 0 : index
    %c0_0 = arith.constant 0 : index
    %0 = vector.load %arg1[%c0, %c0_0] : memref<8x32xf32, #tpu.memory_space<vmem>>, vector<8x32xf32>
    %1 = arith.truncf %0 : vector<8x32xf32> to vector<8x32xbf16>
    %c0_1 = arith.constant 0 : index
    %c0_2 = arith.constant 0 : index
    %2 = vector.load %arg2[%c0_1, %c0_2] : memref<32x64xbf16, #tpu.memory_space<vmem>>, vector<32x64xbf16>
    %cst = arith.constant dense<0.000000e+00> : vector<8x64xf32>
    %3 = tpu.matmul %1, %2, %cst {dimension_numbers = #tpu.dot_dimension_numbers<[1], [0], [0], [1], [0, 0, 1, 1], [], []>} : vector<8x32xbf16>, vector<32x64xbf16>, vector<8x64xf32> -> vector<8x64xf32>
    %c0_3 = arith.constant 0 : index
    %c0_4 = arith.constant 0 : index
    %4 = vector.load %arg3[%c0_3, %c0_4] : memref<1x64xf32, #tpu.memory_space<vmem>>, vector<1x64xf32>
    %5 = vector.broadcast %4 : vector<1x64xf32> to vector<8x64xf32>
    %6 = arith.addf %3, %5 : vector<8x64xf32>
    %cst_5 = arith.constant 0.000000e+00 : f32
    %7 = vector.broadcast %cst_5 : f32 to vector<8x64xf32>
    %8 = arith.maximumf %6, %7 : vector<8x64xf32>
    %9 = arith.truncf %8 : vector<8x64xf32> to vector<8x64xbf16>
    %c0_6 = arith.constant 0 : index
    %c0_7 = arith.constant 0 : index
    %10 = vector.load %arg4[%c0_6, %c0_7] : memref<64x32xbf16, #tpu.memory_space<vmem>>, vector<64x32xbf16>
    %cst_8 = arith.constant dense<0.000000e+00> : vector<8x32xf32>
    %11 = tpu.matmul %9, %10, %cst_8 {dimension_numbers = #tpu.dot_dimension_numbers<[1], [0], [0], [1], [0, 0, 1, 1], [], []>} : vector<8x64xbf16>, vector<64x32xbf16>, vector<8x32xf32> -> vector<8x32xf32>
    %c0_9 = arith.constant 0 : index
    %c0_10 = arith.constant 0 : index
    %12 = vector.load %arg5[%c0_9, %c0_10] : memref<1x32xf32, #tpu.memory_space<vmem>>, vector<1x32xf32>
    %13 = vector.broadcast %12 : vector<1x32xf32> to vector<8x32xf32>
    %14 = arith.addf %11, %13 : vector<8x32xf32>
    %cst_11 = arith.constant 0.000000e+00 : f32
    %15 = vector.broadcast %cst_11 : f32 to vector<8x32xf32>
    %16 = arith.maximumf %14, %15 : vector<8x32xf32>
    %17 = arith.truncf %16 : vector<8x32xf32> to vector<8x32xbf16>
    %c0_12 = arith.constant 0 : index
    %c0_13 = arith.constant 0 : index
    %18 = vector.load %arg6[%c0_12, %c0_13] : memref<32x16xbf16, #tpu.memory_space<vmem>>, vector<32x16xbf16>
    %cst_14 = arith.constant dense<0.000000e+00> : vector<8x16xf32>
    %19 = tpu.matmul %17, %18, %cst_14 {dimension_numbers = #tpu.dot_dimension_numbers<[1], [0], [0], [1], [0, 0, 1, 1], [], []>} : vector<8x32xbf16>, vector<32x16xbf16>, vector<8x16xf32> -> vector<8x16xf32>
    %c0_15 = arith.constant 0 : index
    %c0_16 = arith.constant 0 : index
    %20 = vector.load %arg7[%c0_15, %c0_16] : memref<1x16xf32, #tpu.memory_space<vmem>>, vector<1x16xf32>
    %21 = vector.broadcast %20 : vector<1x16xf32> to vector<8x16xf32>
    %22 = arith.addf %19, %21 : vector<8x16xf32>
    %cst_17 = arith.constant 0.000000e+00 : f32
    %23 = vector.broadcast %cst_17 : f32 to vector<8x16xf32>
    %24 = arith.maximumf %22, %23 : vector<8x16xf32>
    %25 = arith.truncf %24 : vector<8x16xf32> to vector<8x16xbf16>
    %c0_18 = arith.constant 0 : index
    %c0_19 = arith.constant 0 : index
    %26 = vector.load %arg8[%c0_18, %c0_19] : memref<16x8xbf16, #tpu.memory_space<vmem>>, vector<16x8xbf16>
    %cst_20 = arith.constant dense<0.000000e+00> : vector<8x8xf32>
    %27 = tpu.matmul %25, %26, %cst_20 {dimension_numbers = #tpu.dot_dimension_numbers<[1], [0], [0], [1], [0, 0, 1, 1], [], []>} : vector<8x16xbf16>, vector<16x8xbf16>, vector<8x8xf32> -> vector<8x8xf32>
    %c0_21 = arith.constant 0 : index
    %c0_22 = arith.constant 0 : index
    %28 = vector.load %arg9[%c0_21, %c0_22] : memref<1x8xf32, #tpu.memory_space<vmem>>, vector<1x8xf32>
    %29 = vector.broadcast %28 : vector<1x8xf32> to vector<8x8xf32>
    %30 = arith.addf %27, %29 : vector<8x8xf32>
    %c0_23 = arith.constant 0 : index
    %c0_24 = arith.constant 0 : index
    %31 = vector.load %arg10[%c0_23, %c0_24] : memref<8x8xf32, #tpu.memory_space<vmem>>, vector<8x8xf32>
    tpu.vector_store %arg10[%c0_23, %c0_24], %30 {strides = array<i32>} : memref<8x8xf32, #tpu.memory_space<vmem>>, vector<8x8xf32>,
    return
  }
  func.func @transform_0(%arg0: i32) -> (i32, i32) {
    %c0_i32 = arith.constant 0 : i32
    %c0_i32_0 = arith.constant 0 : i32
    return %arg0, %c0_i32 : i32, i32
  }
  func.func @transform_1(%arg0: i32) -> (i32, i32) {
    %c0_i32 = arith.constant 0 : i32
    %c0_i32_0 = arith.constant 0 : i32
    %c0_i32_1 = arith.constant 0 : i32
    return %c0_i32, %c0_i32_0 : i32, i32
  }
  func.func @transform_2(%arg0: i32) -> (i32, i32) {
    %c0_i32 = arith.constant 0 : i32
    %c0_i32_0 = arith.constant 0 : i32
    %c0_i32_1 = arith.constant 0 : i32
    return %c0_i32, %c0_i32_0 : i32, i32
  }
  func.func @transform_3(%arg0: i32) -> (i32, i32) {
    %c0_i32 = arith.constant 0 : i32
    %c0_i32_0 = arith.constant 0 : i32
    %c0_i32_1 = arith.constant 0 : i32
    return %c0_i32, %c0_i32_0 : i32, i32
  }
  func.func @transform_4(%arg0: i32) -> (i32, i32) {
    %c0_i32 = arith.constant 0 : i32
    %c0_i32_0 = arith.constant 0 : i32
    %c0_i32_1 = arith.constant 0 : i32
    return %c0_i32, %c0_i32_0 : i32, i32
  }
  func.func @transform_5(%arg0: i32) -> (i32, i32) {
    %c0_i32 = arith.constant 0 : i32
    %c0_i32_0 = arith.constant 0 : i32
    %c0_i32_1 = arith.constant 0 : i32
    return %c0_i32, %c0_i32_0 : i32, i32
  }
  func.func @transform_6(%arg0: i32) -> (i32, i32) {
    %c0_i32 = arith.constant 0 : i32
    %c0_i32_0 = arith.constant 0 : i32
    %c0_i32_1 = arith.constant 0 : i32
    return %c0_i32, %c0_i32_0 : i32, i32
  }
  func.func @transform_7(%arg0: i32) -> (i32, i32) {
    %c0_i32 = arith.constant 0 : i32
    %c0_i32_0 = arith.constant 0 : i32
    %c0_i32_1 = arith.constant 0 : i32
    return %c0_i32, %c0_i32_0 : i32, i32
  }
  func.func @transform_8(%arg0: i32) -> (i32, i32) {
    %c0_i32 = arith.constant 0 : i32
    %c0_i32_0 = arith.constant 0 : i32
    %c0_i32_1 = arith.constant 0 : i32
    return %c0_i32, %c0_i32_0 : i32, i32
  }
  func.func @transform_9(%arg0: i32) -> (i32, i32) {
    %c0_i32 = arith.constant 0 : i32
    %c0_i32_0 = arith.constant 0 : i32
    return %arg0, %c0_i32 : i32, i32
  }
}

</mosaic_0001>

<bundles_post_ra>
// kernel: tpu_custom_call.1
= control target key start
LH: loop header
LB: loop body
LE: loop exit
PB: predicated region body
PF: predicated region fallthrough
CT: control target
= control target key end

     0   :  { %v433_v1 = vmov 0.0   ;;  %vm434_vm0 = vmmov 0   ;;  %vm59_vm1 = vcmask 261120   ;;  %s546_s0 = inlined_call_operand.vmem [shape: f32[8,32], index: 0, kind: input, shape index: {}]   ;;  %s547_s1 = inlined_call_operand.vmem [shape: bf16[32,64], index: 1, kind: input, shape index: {}]   ;;  %s548_s2 = inlined_call_operand.vmem [shape: f32[1,64], index: 2, kind: input, shape index: {}]   ;;  %s549_s3 = inlined_call_operand.vmem [shape: bf16[64,32], index: 3, kind: input, shape index: {}]   ;;  %s550_s4 = inlined_call_operand.vmem [shape: f32[1,32], index: 4, kind: input, shape index: {}]   ;;  %s551_s5 = inlined_call_operand.vmem [shape: bf16[32,16], index: 5, kind: input, shape index: {}]   ;;  %s552_s6 = inlined_call_operand.vmem [shape: f32[1,16], index: 6, kind: input, shape index: {}]   ;;  %s553_s7 = inlined_call_operand.vmem [shape: bf16[16,8], index: 7, kind: input, shape index: {}]   ;;  %s554_s8 = inlined_call_operand.vmem [shape: f32[1,8], index: 8, kind: input, shape index: {}]   ;;  %s555_s9 = inlined_call_operand.hbm [shape: f32[8,8], index: 9, kind: output, shape index: {}]  }
   0x1   :  { %v400_v0 = vld [vmem:[%s547_s1] sm:$0xff]   ;;  %363 = vmatprep.subr.bf16.mxu0 %v433_v1  ;;  %v401_v2 = vld [vmem:[%s547_s1 + $0x8] sm:$0xff]   ;;  %371 = vmatprep.subr.bf16.mxu1 %v433_v1 }
   0x2   :  { %364 = vmatpush3.bf16.msra.mxu0 %v400_v0  ;;  %367 = vmatprep.mubr.msk.bf16.mxu0 %vm434_vm0, %v433_v1  ;;  %v34_v3 = vld [vmem:[%s546_s0] sm:$0xff]  ;;  %v403_v5 = vld [vmem:[%s549_s3 + $0x8] sm:$0xff]  }
   0x3   :  { %365 = vmatprep.subr.bf16.mxu0 %v433_v1  ;;  %v402_v4 = vld [vmem:[%s549_s3] sm:$0xff]   ;;  %379 = vmatprep.mubr.msk.bf16.mxu1 %vm434_vm0, %v433_v1  ;;  %v35_v6 = vpack.c.bf16 %v34_v3, %v34_v3 }
   0x4   :  { %372 = vmatpush3.bf16.msra.mxu1 %v402_v4 }
   0x5   :  { %373 = vmatprep.subr.bf16.mxu1 %v433_v1 }
   0x6   :  { %366 = vmatpush3.bf16.msra.mxu0 %v401_v2 }
   0x7   :  { %383 = vmatprep.subr.bf16.mxu0 %v433_v1 }
   0x8   :  { %14 = vsyncpa [#allocation3], 0  ;;  %374 = vmatpush3.bf16.msra.mxu1 %v403_v5  ;;  %v404_v7 = vld [vmem:[%s549_s3 + $0x10] sm:$0xff]   ;;  %v405_v8 = vld [vmem:[%s549_s3 + $0x18] sm:$0xff]   ;;  %vm144_vm2 = vcmask 523264   ;;  %vm273_vm3 = vcmask 130048  }
   0x9   :  { %368 = vmatmul.mubr.msk.bf16.vlgmr.msra.gmra.mrb[0].mxu0 %vm59_vm1, %v35_v6  ;;  %375 = vmatprep.subr.bf16.mxu1 %v433_v1  ;;  %v406_v9 = vld [vmem:[%s551_s5] sm:$0xff]   ;;  %v407_v18 = vld [vmem:[%s551_s5 + $0x8] sm:$0xff]   ;;  %s435_s30 = smov [#allocation2]   ;;  %vm317_vm4 = vcmask 64512  }
   0xa   :  { %387 = vmatprep.mubr.msk.bf16.mxu0 %vm434_vm0, %v433_v1  ;;  %384 = vmatpush3.bf16.msra.mxu0 %v406_v9  ;;  %v333_v10 = vld [vmem:[%s548_s2] ss:$0 sm:$0xff]  ;;  %s325_s10 = sshll.u32 %s435_s30, 4  ;;  %s326_s10 = int_to_ptr.vmem [resolvable:$true] %s325_s10 }
   0xb   :  { %385 = vmatprep.subr.bf16.mxu0 %v433_v1  ;;  %v337_v19 = vld [vmem:[%s550_s4] ss:$0 sm:$0xff]  ;;  %p414_p1 = scmp.lt.s32.totalorder %s326_s10, %s326_s10 }
   0xc   :  { %376 = vmatpush3.bf16.msra.mxu1 %v404_v7  ;;  %v408_v26 = vld [vmem:[%s553_s7] sm:$0xff]  }
   0xd   :  { %377 = vmatprep.subr.bf16.mxu1 %v433_v1  ;;  %v343_v28 = vld [vmem:[%s552_s6] ss:$0 sm:$0xff]  ;;  %s409_s6 = scalar_lea.vmem %s326_s10, 128 }
   0xe   :  { %386 = vmatpush3.bf16.msra.mxu0 %v407_v18  ;;  %v347_v36 = vld [vmem:[%s554_s8] ss:$0 sm:$0xff]  ;;  %p410_p0 = scmp.ne.s32.totalorder %s326_s10, %s409_s6  ;;  %p415_p2 = scmp.lt.s32.totalorder %s409_s6, %s409_s6 }
   0xf   :  { %391 = vmatprep.subr.bf16.mxu0 %v433_v1 }
  0x10   :  { %378 = vmatpush3.bf16.msra.mxu1 %v405_v8  ;;  %p416_p3 = por %p415_p2, %p414_p1 }
  0x12   :  { %p417_p4 = pnand %p416_p3, %p410_p0 }
  0xdc   :  { %v97_v11 = vpop.f32.mrb[0].mxu0 }
  0xdd   :  { %v98_v12 = vadd.f32 %v333_v10, %v97_v11  ;;  %v369_v13 = vpop.f32.mrb[1].mxu0 }
  0xde   :  { %v100_v14 = vpop.f32.mrb[2].mxu0 }
  0xdf   :  { %v103_v15 = vmax.f32 %v98_v12, 0.0  ;;  %v370_v16 = vpop.f32.mrb[3].mxu0 }
  0xe1   :  { %v104_v17 = vpack.c.bf16 %v103_v15, %v103_v15 }
  0xe3   :  { %380 = vmatmul.mubr.msk.bf16.vlgmr.msra.gmra.mrb[0].mxu1 %vm144_vm2, %v104_v17 }
 0x1b6   :  { %v182_v20 = vpop.f32.mrb[0].mxu1 }
 0x1b7   :  { %v183_v21 = vadd.f32 %v337_v19, %v182_v20  ;;  %v381_v22 = vpop.f32.mrb[1].mxu1 }
 0x1b8   :  { %v185_v23 = vpop.f32.mrb[2].mxu1 }
 0x1b9   :  { %v188_v24 = vmax.f32 %v183_v21, 0.0  ;;  %v382_v25 = vpop.f32.mrb[3].mxu1 }
 0x1bb   :  { %v189_v27 = vpack.c.bf16 %v188_v24, %v188_v24 }
 0x1bd   :  { %388 = vmatmul.mubr.msk.bf16.vlgmr.msra.gmra.mrb[4].mxu0 %vm59_vm1, %v189_v27 }
 0x1be   :  { %392 = vmatpush3.bf16.msra.mxu0 %v408_v26  ;;  %393 = vmatprep.mubr.msk.bf16.mxu0 %vm434_vm0, %v433_v1 }
 0x290   :  { %v250_v29 = vpop.f32.mrb[4].mxu0 }
 0x291   :  { %v251_v30 = vadd.f32 %v343_v28, %v250_v29  ;;  %v389_v31 = vpop.f32.mrb[5].mxu0 }
 0x292   :  { %v253_v32 = vpop.f32.mrb[6].mxu0 }
 0x293   :  { %v256_v33 = vmax.f32 %v251_v30, 0.0  ;;  %v390_v34 = vpop.f32.mrb[7].mxu0 }
 0x295   :  { %v257_v35 = vpack.c.bf16 %v256_v33, %v256_v33 }
 0x297   :  { %394 = vmatmul.mubr.msk.bf16.vlgmr.msra.gmra.mrb[8].mxu0 %vm273_vm3, %v257_v35 }
 0x36a   :  { %v311_v37 = vpop.f32.mrb[8].mxu0 }
 0x36b   :  { %v312_v38 = vadd.f32 %v347_v36, %v311_v37  ;;  %v395_v39 = vpop.f32.mrb[9].mxu0 }
 0x36c   :  { %v314_v40 = vpop.f32.mrb[10].mxu0 }
 0x36d   :  { %v396_v41 = vpop.f32.mrb[11].mxu0  ;;  %318 = vst.msk [vmem:[#allocation2] sm:$0xff] %vm317_vm4, %v312_v38 }
 0x36e   :  { %420 = shalt.err (!%p417_p4)
}
 0x36f   :  { %s421_s8 = scalar_lea.hbm %s555_s9, 128 }
 0x370   :  { %p422_p5 = scmp.ne.s32.totalorder %s555_s9, %s421_s8  ;;  %p425_p6 = scmp.lt.u32.totalorder %s421_s8, %s555_s9 }
 0x372   :  { %p427_p7 = pnand %p425_p6, %p422_p5 }
 0x374   :  { %430 = shalt.err (!%p427_p7)
}
 0x375   :  { %328 = dma.vmem_to_hbm [thread:$0]  %s326_s10, 128, %s555_s9, [#allocation3]  }
 0x376   :  { %431 = dma.done.wait [#allocation3], 128  }
 0x377   :  { %432 = vsyncadd [#allocation3], 4294967168 }
 0x378   :  { %332 = vsyncpa [#allocation3], 1 }

</bundles_post_ra>
